<compile_context>
chip_gen: v5e
topology: v5e:2x2
jax: 0.10.0
libtpu: 0.0.40
codegen_flags: <defaults>
</compile_context>

<pallas_src>
import numpy as np
import jax
import jax.numpy as jnp
from jax.experimental import pallas as pl
from jax.experimental.pallas import tpu as pltpu


def _round_up(x, m):
    return ((x + m - 1) // m) * m


def _sublane_multiple(dtype):
    # Minimum second-to-last tile dim per dtype: f32 -> 8, bf16 -> 16, int8/fp8 -> 32.
    return max(8, 32 // jnp.dtype(dtype).itemsize)


# --------------------------------------------------------------------------------------
# Path A: VMEM-resident table, one-hot MXU gather, lane-dense packed output.
# --------------------------------------------------------------------------------------
def _make_onehot_kernel(tp, g, v, e):
    def kernel(idx_ref, w_ref, out_ref):
        # idx_ref: (tp, g) int32 VMEM block  -- g consecutive row-indices per output row
        # w_ref:   (v, e) table, resident in VMEM (constant index_map -> fetched once)
        # out_ref: (tp, g*e) lane-dense output block
        idx = idx_ref[...]
        w = w_ref[...]
        iota = jax.lax.broadcasted_iota(jnp.int32, (tp, v), 1)
        parts = []
        for s in range(g):  # g = 128 // E (small), static unroll
            onehot = (idx[:, s:s + 1] == iota).astype(w.dtype)          # (tp, v)
            parts.append(jnp.dot(onehot, w, preferred_element_type=jnp.float32))
        packed = parts[0] if g == 1 else jnp.concatenate(parts, axis=-1)  # (tp, g*e)
        out_ref[...] = packed.astype(out_ref.dtype)
    return kernel


def _embed_resident(idx, w, *, packed_rows_per_tile=256):
    n_rows = idx.shape[0]
    v, e = w.shape
    # Pack g consecutive rows per lane-dense output row when E divides 128.
    g = 128 // e if (e < 128 and 128 % e == 0) else 1
    sub = _sublane_multiple(w.dtype)

    n_packed = pl.cdiv(n_rows, g)
    tp = _round_up(min(packed_rows_per_tile, _round_up(n_packed, sub)), sub)
    n_packed_pad = _round_up(n_packed, tp)
    n_rows_pad = n_packed_pad * g

    idx_pad = jnp.pad(idx, (0, n_rows_pad - n_rows))          # pad with row 0 (valid)
    idx_packed = idx_pad.reshape(n_packed_pad, g)

    out_packed = pl.pallas_call(
        _make_onehot_kernel(tp, g, v, e),
        out_shape=jax.ShapeDtypeStruct((n_packed_pad, g * e), w.dtype),
        grid=(n_packed_pad // tp,),
        in_specs=[
            pl.BlockSpec((tp, g), lambda i: (i, 0)),    # per-tile indices (VMEM, tiny)
            pl.BlockSpec((v, e), lambda i: (0, 0)),     # whole table; constant block -> one DMA
        ],
        out_specs=pl.BlockSpec((tp, g * e), lambda i: (i, 0)),
        compiler_params=pltpu.CompilerParams(
            dimension_semantics=("parallel",)),         # multi-step grid splits across TCs
    )(idx_packed, w)

    return out_packed.reshape(n_rows_pad, e)[:n_rows]


# --------------------------------------------------------------------------------------
# Path B: table stays in HBM, per-row DMA gather straight into the output block.
# --------------------------------------------------------------------------------------
def _make_hbm_gather_kernel(rows_per_tile):
    def kernel(idx_ref, w_hbm, out_ref, sem):
        # idx_ref: SMEM (n_rows_pad,) int32  -- scalar-prefetched flat indices
        # w_hbm:   (V, E) table left in HBM  -- never copied wholesale
        # out_ref: (rows_per_tile, E) VMEM   -- gather DMAs land here directly (no buf)
        # sem:     single shared DMA semaphore for all row copies
        base = pl.multiple_of(pl.program_id(0) * rows_per_tile, rows_per_tile)
        copies = []
        # Static unroll: issue every row gather before waiting so all DMAs are in
        # flight together (and overlap the previous tile's output writeback).
        for r in range(rows_per_tile):
            row = idx_ref[base + r]
            cp = pltpu.make_async_copy(
                w_hbm.at[pl.ds(row, 1), :],     # (1, E) row in HBM
                out_ref.at[pl.ds(r, 1), :],     # lands directly in the output tile
                sem,
            )
            cp.start()
            copies.append(cp)
        for cp in copies:                       # homogeneous copies on one shared sem
            cp.wait()
    return kernel


def _embed_hbm_gather(idx, w, *, rows_per_tile=128, max_rows_per_call=1 << 16):
    n_rows = idx.shape[0]
    v, e = w.shape

    # Keep the scalar-prefetched index array comfortably inside SMEM: chunk the call.
    if n_rows > max_rows_per_call:
        outs = []
        for s in range(0, n_rows, max_rows_per_call):
            outs.append(_embed_hbm_gather(idx[s:s + max_rows_per_call], w,
                                          rows_per_tile=rows_per_tile,
                                          max_rows_per_call=max_rows_per_call))
        return jnp.concatenate(outs, axis=0)

    sub = _sublane_multiple(w.dtype)
    rpt = _round_up(min(rows_per_tile, _round_up(n_rows, sub)), sub)
    assert rpt <= 512, "rows_per_tile static unroll capped at 512"
    n_pad = _round_up(n_rows, rpt)
    idx_pad = jnp.pad(idx, (0, n_pad - n_rows))            # pad with row 0 (valid)

    out = pl.pallas_call(
        _make_hbm_gather_kernel(rpt),
        out_shape=jax.ShapeDtypeStruct((n_pad, e), w.dtype),
        grid_spec=pltpu.PrefetchScalarGridSpec(
            num_scalar_prefetch=1,                          # idx -> SMEM
            grid=(n_pad // rpt,),
            in_specs=[pl.BlockSpec(memory_space=pl.ANY)],   # table stays in HBM
            out_specs=pl.BlockSpec((rpt, e), lambda i, idx_ref: (i, 0)),
            scratch_shapes=[pltpu.SemaphoreType.DMA],       # one shared DMA semaphore
        ),
        compiler_params=pltpu.CompilerParams(
            dimension_semantics=("parallel",)),
    )(idx_pad, w)

    return out[:n_rows]


# --------------------------------------------------------------------------------------
# Public wrapper (matches FeatureEmbedding.forward).
# --------------------------------------------------------------------------------------
def feature_embedding(x, offsets, w, *,
                      force_hbm_gather=False,
                      rows_per_tile=128,
                      packed_rows_per_tile=256,
                      vmem_table_limit_bytes=8 * 2**20,
                      onehot_max_vocab=1024):
    """out[b, f, :] = w[x[b, f] + offsets[f], :]  ->  (batch, num_fields, embed_dim)

    Indices must satisfy 0 <= x[b, f] + offsets[f] < w.shape[0] (nn.Embedding contract).
    """
    b, f = x.shape
    v, e = w.shape

    # Fold per-field offsets into the indices on the XLA side (one add) and flatten.
    idx = (x.astype(jnp.int32) + offsets.astype(jnp.int32)[None, :]).reshape(-1)

    table_bytes = v * e * jnp.dtype(w.dtype).itemsize
    # Resident-table threshold is conservative so the double-buffered table block stays
    # well under the 32 MiB scoped-VMEM default on v7x (64 MiB physical) as well as
    # v5e/v6e; the vocab cap bounds the one-hot intermediate size.
    use_resident = (not force_hbm_gather
                    and table_bytes <= vmem_table_limit_bytes
                    and v <= onehot_max_vocab)

    if use_resident:
        out_flat = _embed_resident(idx, w, packed_rows_per_tile=packed_rows_per_tile)
    else:
        # TODO(synk): a VMEM-resident dynamic-slice gather (no one-hot) would cover
        # mid-sized tables (vocab > onehot_max_vocab but still VMEM-sized) faster than
        # per-row HBM DMAs.
        out_flat = _embed_hbm_gather(idx, w, rows_per_tile=rows_per_tile)

    return out_flat.reshape(b, f, e)


if __name__ == "__main__":
    key = jax.random.PRNGKey(0)
    field_dims = [3, 4, 6, 5]
    embed_dim = 16
    vocab = int(sum(field_dims))
    num_fields = len(field_dims)
    batch = 8

    k_w, k_x = jax.random.split(key)

    # nn.init.xavier_uniform_ on (vocab, embed_dim)
    limit = float(np.sqrt(6.0 / (vocab + embed_dim)))
    w = jax.random.uniform(k_w, (vocab, embed_dim), minval=-limit, maxval=limit,
                           dtype=jnp.float32)

    # per-field indices in [0, field_dims[j])
    maxes = jnp.array(field_dims, dtype=jnp.float32)
    u = jax.random.uniform(k_x, (batch, num_fields))
    x = jnp.floor(u * maxes).astype(jnp.int32)

    offsets = jnp.array([0, *np.cumsum(field_dims)[:-1]], dtype=jnp.int32)

    # pure-JAX reference of the PyTorch forward
    ref = w[(x + offsets[None, :])]            # (batch, num_fields, embed_dim)

    # Fast path: VMEM-resident table + one-hot MXU gather, lane-dense packed output.
    out_a = jax.block_until_ready(feature_embedding(x, offsets, w))
    assert out_a.shape == (batch, num_fields, embed_dim)
    assert jnp.allclose(out_a, ref, atol=1e-6)

    # Large-vocab path: HBM row-gather DMAs landing directly in the output tile.
    out_b = jax.block_until_ready(
        feature_embedding(x, offsets, w, force_hbm_gather=True))
    assert out_b.shape == (batch, num_fields, embed_dim)
    assert jnp.allclose(out_b, ref, atol=1e-6)

    print("KERNEL_OK")
</pallas_src>

<mosaic_0001>
module attributes {stable_mosaic.version = 11 : i64} {
  func.func @kernel(%arg0: i32, %arg1: memref<8x8xi32, #tpu.memory_space<vmem>>, %arg2: memref<18x16xf32, #tpu.memory_space<vmem>>, %arg3: memref<8x128xf32, #tpu.memory_space<vmem>>) attributes {dimension_semantics = [#tpu.dimension_semantics<parallel>], iteration_bounds = array<i64: 1>, scalar_prefetch = 0 : i64, scratch_operands = 0 : i64, tpu.core_type = #tpu.core_type<tc>, window_params = [{transform_indices = @transform_0, window_bounds = array<i64: 8, 8>}, {pipeline_mode = #tpu.pipeline_mode<synchronous>, transform_indices = @transform_1, window_bounds = array<i64: 18, 16>}, {transform_indices = @transform_2, window_bounds = array<i64: 8, 128>}]} {
    %c0 = arith.constant 0 : index
    %c0_0 = arith.constant 0 : index
    %0 = vector.load %arg1[%c0, %c0_0] : memref<8x8xi32, #tpu.memory_space<vmem>>, vector<8x8xi32>
    %c0_1 = arith.constant 0 : index
    %c0_2 = arith.constant 0 : index
    %1 = vector.load %arg2[%c0_1, %c0_2] : memref<18x16xf32, #tpu.memory_space<vmem>>, vector<18x16xf32>
    %2 = tpu.iota {dimensions = array<i32: 1>} : vector<8x18xi32>
    %3 = vector.extract_strided_slice %0 {offsets = [0, 0], sizes = [8, 1], strides = [1, 1]} : vector<8x8xi32> to vector<8x1xi32>
    %4 = vector.broadcast %3 : vector<8x1xi32> to vector<8x18xi32>
    %5 = arith.cmpi eq, %4, %2 : vector<8x18xi32>
    %6 = arith.extui %5 : vector<8x18xi1> to vector<8x18xi32>
    %7 = arith.sitofp %6 : vector<8x18xi32> to vector<8x18xf32>
    %cst = arith.constant dense<0.000000e+00> : vector<8x16xf32>
    %8 = tpu.matmul %7, %1, %cst {dimension_numbers = #tpu.dot_dimension_numbers<[1], [0], [0], [1], [0, 0, 1, 1], [], []>} : vector<8x18xf32>, vector<18x16xf32>, vector<8x16xf32> -> vector<8x16xf32>
    %9 = vector.extract_strided_slice %0 {offsets = [0, 1], sizes = [8, 1], strides = [1, 1]} : vector<8x8xi32> to vector<8x1xi32>
    %10 = vector.broadcast %9 : vector<8x1xi32> to vector<8x18xi32>
    %11 = arith.cmpi eq, %10, %2 : vector<8x18xi32>
    %12 = arith.extui %11 : vector<8x18xi1> to vector<8x18xi32>
    %13 = arith.sitofp %12 : vector<8x18xi32> to vector<8x18xf32>
    %cst_3 = arith.constant dense<0.000000e+00> : vector<8x16xf32>
    %14 = tpu.matmul %13, %1, %cst_3 {dimension_numbers = #tpu.dot_dimension_numbers<[1], [0], [0], [1], [0, 0, 1, 1], [], []>} : vector<8x18xf32>, vector<18x16xf32>, vector<8x16xf32> -> vector<8x16xf32>
    %15 = vector.extract_strided_slice %0 {offsets = [0, 2], sizes = [8, 1], strides = [1, 1]} : vector<8x8xi32> to vector<8x1xi32>
    %16 = vector.broadcast %15 : vector<8x1xi32> to vector<8x18xi32>
    %17 = arith.cmpi eq, %16, %2 : vector<8x18xi32>
    %18 = arith.extui %17 : vector<8x18xi1> to vector<8x18xi32>
    %19 = arith.sitofp %18 : vector<8x18xi32> to vector<8x18xf32>
    %cst_4 = arith.constant dense<0.000000e+00> : vector<8x16xf32>
    %20 = tpu.matmul %19, %1, %cst_4 {dimension_numbers = #tpu.dot_dimension_numbers<[1], [0], [0], [1], [0, 0, 1, 1], [], []>} : vector<8x18xf32>, vector<18x16xf32>, vector<8x16xf32> -> vector<8x16xf32>
    %21 = vector.extract_strided_slice %0 {offsets = [0, 3], sizes = [8, 1], strides = [1, 1]} : vector<8x8xi32> to vector<8x1xi32>
    %22 = vector.broadcast %21 : vector<8x1xi32> to vector<8x18xi32>
    %23 = arith.cmpi eq, %22, %2 : vector<8x18xi32>
    %24 = arith.extui %23 : vector<8x18xi1> to vector<8x18xi32>
    %25 = arith.sitofp %24 : vector<8x18xi32> to vector<8x18xf32>
    %cst_5 = arith.constant dense<0.000000e+00> : vector<8x16xf32>
    %26 = tpu.matmul %25, %1, %cst_5 {dimension_numbers = #tpu.dot_dimension_numbers<[1], [0], [0], [1], [0, 0, 1, 1], [], []>} : vector<8x18xf32>, vector<18x16xf32>, vector<8x16xf32> -> vector<8x16xf32>
    %27 = vector.extract_strided_slice %0 {offsets = [0, 4], sizes = [8, 1], strides = [1, 1]} : vector<8x8xi32> to vector<8x1xi32>
    %28 = vector.broadcast %27 : vector<8x1xi32> to vector<8x18xi32>
    %29 = arith.cmpi eq, %28, %2 : vector<8x18xi32>
    %30 = arith.extui %29 : vector<8x18xi1> to vector<8x18xi32>
    %31 = arith.sitofp %30 : vector<8x18xi32> to vector<8x18xf32>
    %cst_6 = arith.constant dense<0.000000e+00> : vector<8x16xf32>
    %32 = tpu.matmul %31, %1, %cst_6 {dimension_numbers = #tpu.dot_dimension_numbers<[1], [0], [0], [1], [0, 0, 1, 1], [], []>} : vector<8x18xf32>, vector<18x16xf32>, vector<8x16xf32> -> vector<8x16xf32>
    %33 = vector.extract_strided_slice %0 {offsets = [0, 5], sizes = [8, 1], strides = [1, 1]} : vector<8x8xi32> to vector<8x1xi32>
    %34 = vector.broadcast %33 : vector<8x1xi32> to vector<8x18xi32>
    %35 = arith.cmpi eq, %34, %2 : vector<8x18xi32>
    %36 = arith.extui %35 : vector<8x18xi1> to vector<8x18xi32>
    %37 = arith.sitofp %36 : vector<8x18xi32> to vector<8x18xf32>
    %cst_7 = arith.constant dense<0.000000e+00> : vector<8x16xf32>
    %38 = tpu.matmul %37, %1, %cst_7 {dimension_numbers = #tpu.dot_dimension_numbers<[1], [0], [0], [1], [0, 0, 1, 1], [], []>} : vector<8x18xf32>, vector<18x16xf32>, vector<8x16xf32> -> vector<8x16xf32>
    %39 = vector.extract_strided_slice %0 {offsets = [0, 6], sizes = [8, 1], strides = [1, 1]} : vector<8x8xi32> to vector<8x1xi32>
    %40 = vector.broadcast %39 : vector<8x1xi32> to vector<8x18xi32>
    %41 = arith.cmpi eq, %40, %2 : vector<8x18xi32>
    %42 = arith.extui %41 : vector<8x18xi1> to vector<8x18xi32>
    %43 = arith.sitofp %42 : vector<8x18xi32> to vector<8x18xf32>
    %cst_8 = arith.constant dense<0.000000e+00> : vector<8x16xf32>
    %44 = tpu.matmul %43, %1, %cst_8 {dimension_numbers = #tpu.dot_dimension_numbers<[1], [0], [0], [1], [0, 0, 1, 1], [], []>} : vector<8x18xf32>, vector<18x16xf32>, vector<8x16xf32> -> vector<8x16xf32>
    %45 = vector.extract_strided_slice %0 {offsets = [0, 7], sizes = [8, 1], strides = [1, 1]} : vector<8x8xi32> to vector<8x1xi32>
    %46 = vector.broadcast %45 : vector<8x1xi32> to vector<8x18xi32>
    %47 = arith.cmpi eq, %46, %2 : vector<8x18xi32>
    %48 = arith.extui %47 : vector<8x18xi1> to vector<8x18xi32>
    %49 = arith.sitofp %48 : vector<8x18xi32> to vector<8x18xf32>
    %cst_9 = arith.constant dense<0.000000e+00> : vector<8x16xf32>
    %50 = tpu.matmul %49, %1, %cst_9 {dimension_numbers = #tpu.dot_dimension_numbers<[1], [0], [0], [1], [0, 0, 1, 1], [], []>} : vector<8x18xf32>, vector<18x16xf32>, vector<8x16xf32> -> vector<8x16xf32>
    %51 = tpu.concatenate %8, %14, %20, %26, %32, %38, %44, %50 in 1 : vector<8x16xf32>, vector<8x16xf32>, vector<8x16xf32>, vector<8x16xf32>, vector<8x16xf32>, vector<8x16xf32>, vector<8x16xf32>, vector<8x16xf32> -> vector<8x128xf32>
    %c0_10 = arith.constant 0 : index
    %c0_11 = arith.constant 0 : index
    %52 = vector.load %arg3[%c0_10, %c0_11] : memref<8x128xf32, #tpu.memory_space<vmem>>, vector<8x128xf32>
    tpu.vector_store %arg3[%c0_10, %c0_11], %51 {strides = array<i32>} : memref<8x128xf32, #tpu.memory_space<vmem>>, vector<8x128xf32>,
    return
  }
  func.func @transform_0(%arg0: i32) -> (i32, i32) {
    %c0_i32 = arith.constant 0 : i32
    %c0_i32_0 = arith.constant 0 : i32
    return %arg0, %c0_i32 : i32, i32
  }
  func.func @transform_1(%arg0: i32) -> (i32, i32) {
    %c0_i32 = arith.constant 0 : i32
    %c0_i32_0 = arith.constant 0 : i32
    %c0_i32_1 = arith.constant 0 : i32
    return %c0_i32, %c0_i32_0 : i32, i32
  }
  func.func @transform_2(%arg0: i32) -> (i32, i32) {
    %c0_i32 = arith.constant 0 : i32
    %c0_i32_0 = arith.constant 0 : i32
    return %arg0, %c0_i32 : i32, i32
  }
}

</mosaic_0001>

<bundles_post_ra>
// kernel: tpu_custom_call.1
= control target key start
LH: loop header
LB: loop body
LE: loop exit
PB: predicated region body
PF: predicated region fallthrough
CT: control target
= control target key end

     0   :  { %v390_v1 = vmov 2   ;;  %v391_v2 = vmov 0   ;;  %vm28_vm0 = vcmask 1041408   ;;  %s453_s0 = inlined_call_operand.vmem [shape: s32[8,8], index: 0, kind: input, shape index: {}]   ;;  %s454_s1 = inlined_call_operand.vmem [shape: f32[18,16], index: 1, kind: input, shape index: {}]   ;;  %s455_s2 = inlined_call_operand.hbm [shape: f32[8,128], index: 2, kind: output, shape index: {}]  }
   0x1   :  { %v12_v0 = vld [vmem:[%s453_s0] sm:$0xff]  ;;  %355 = vset.pattern.permute.xlu0 %v390_v1  ;;  %357 = vset.pattern.permute.xlu1 %v391_v2  ;;  %v15_v3 = vld [vmem:[%s454_s1 + $0x10] sm:$0x3]  ;;  %v14_v4 = vld [vmem:[%s454_s1 + $0x8] sm:$0xff] }
   0x2   :  { %19 = vperm.xlu1 %357, %v12_v0   ;;  %82 = vperm.xlu0 %355, %v12_v0  }
   0x3   :  { %7 = vsyncpa [#allocation3], 0  ;;  %v392_v5 = vmov 6   ;;  %315 = vmatpush.msk.msra.mxu0 %vm28_vm0, %v15_v3  ;;  %321 = vmatpush.msk.msra.mxu2 %vm28_vm0, %v15_v3  ;;  %v393_v6 = vmov 1   ;;  %v394_v7 = vmov 3   ;;  %v395_v8 = vmov 7  }
   0x4   :  { %359 = vset.pattern.permute.xlu2 %v392_v5  ;;  %318 = vmatpush.msk.msra.mxu1 %vm28_vm0, %v15_v3  ;;  %v396_v9 = vmov 4   ;;  %v397_v10 = vmov 5   ;;  %v13_v11 = vld [vmem:[%s454_s1] sm:$0xff]  ;;  %v16_v13 = vlaneseq  ;;  %vm24_vm1 = vcmask 146432   ;;  %s399_s1 = smov 32   ;;  %s400_s16 = smov 16  }
   0x5   :  { %198 = vperm.xlu2 %359, %v12_v0   ;;  %46 = vmatpush.msra.mxu0 %v14_v4  ;;  %v398_v18 = vmov 0.0   ;;  %s401_s17 = smov 48   ;;  %s402_s18 = smov 80   ;;  %vm283_vm10 = vcmask 130048   ;;  %vm285_vm11 = vcmask 261120   ;;  %vm287_vm12 = vcmask 392192  }
   0x6   :  { %104 = vmatpush.msra.mxu2 %v14_v4  ;;  %324 = vmatpush.msk.msra.mxu3 %vm28_vm0, %v15_v3  ;;  %v17_v14 = vand.u32 127, %v16_v13  ;;  %s403_s19 = smov 64   ;;  %s404_s20 = smov 96   ;;  %vm289_vm13 = vcmask 523264   ;;  %vm291_vm14 = vcmask 654336   ;;  %vm293_vm15 = vcmask 785408  }
   0x7   :  { %75 = vmatpush.msra.mxu1 %v14_v4  ;;  %47 = vmatpush.msra.mxu0 %v13_v11  ;;  %s405_s21 = smov 112   ;;  %s406_s22 = smov [#allocation2]  }
   0x8   :  { %133 = vmatpush.msra.mxu3 %v14_v4  ;;  %105 = vmatpush.msra.mxu2 %v13_v11  ;;  %s303_s23 = sshll.u32 %s406_s22, 4  ;;  %s305_s26 = sshll.u32 %s455_s2, 4  ;;  %s304_s23 = int_to_ptr.vmem [resolvable:$true] %s303_s23  ;;  %s306_s26 = int_to_ptr.hbm [resolvable:$true] %s305_s26 }
   0x9   :  { %76 = vmatpush.msra.mxu1 %v13_v11  ;;  %327 = vmatpush.msk.msrb.mxu0 %vm28_vm0, %v15_v3 }
   0xa   :  { %358 = vset.pattern.permute.xlu1 %v393_v6  ;;  %356 = vset.pattern.permute.xlu0 %v394_v7 }
   0xb   :  { %53 = vperm.xlu1 %358, %v12_v0   ;;  %111 = vperm.xlu0 %356, %v12_v0  }
   0xc   :  { %333 = vmatpush.msk.msrb.mxu2 %vm28_vm0, %v15_v3  ;;  %134 = vmatpush.msra.mxu3 %v13_v11 }
   0xd   :  { %360 = vset.pattern.permute.xlu2 %v395_v8  ;;  %162 = vmatpush.msrb.mxu0 %v14_v4 }
   0xe   :  { %227 = vperm.xlu2 %360, %v12_v0   ;;  %220 = vmatpush.msrb.mxu2 %v14_v4 }
   0xf   :  { %336 = vmatpush.msk.msrb.mxu3 %vm28_vm0, %v15_v3  ;;  %330 = vmatpush.msk.msrb.mxu1 %vm28_vm0, %v15_v3  ;;  %vm295_vm0 = vcmask 916480  }
  0x10   :  { %221 = vmatpush.msrb.mxu2 %v13_v11  ;;  %163 = vmatpush.msrb.mxu0 %v13_v11 }
  0x11   :  { %249 = vmatpush.msrb.mxu3 %v14_v4  ;;  %191 = vmatpush.msrb.mxu1 %v14_v4 }
  0x13   :  { %361 = vset.pattern.permute.xlu1 %v396_v9  ;;  %363 = vset.pattern.permute.xlu0 %v395_v8 }
  0x14   :  { %140 = vperm.xlu1 %361, %v12_v0   ;;  %250 = vmatpush.msrb.mxu3 %v13_v11 }
  0x15   :  { %192 = vmatpush.msrb.mxu1 %v13_v11 }
  0x16   :  { %362 = vset.pattern.permute.xlu2 %v397_v10 }
  0x17   :  { %169 = vperm.xlu2 %362, %v12_v0  }
  0x5f   :  { %v199_v12 = vpop.permute.xlu2 %198 }
  0x60   :  { %vm200_vm4 = vcmp.eq.s32.totalorder %v199_v12, %v17_v14 }
  0x61   :  { %v332_v23 = vsel %vm200_vm4, 1.0, %v398_v18 }
  0x68   :  { %v228_v17 = vpop.permute.xlu2 %227 }
  0x69   :  { %vm229_vm8 = vcmp.eq.s32.totalorder %v228_v17, %v17_v14 }
  0x6a   :  { %v335_v29 = vsel %vm229_vm8, 1.0, %v398_v18 }
  0x71   :  { %v170_v26 = vpop.permute.xlu2 %169 }
  0x72   :  { %vm171_vm7 = vcmp.eq.s32.totalorder %v170_v26, %v17_v14 }
  0x73   :  { %v329_v27 = vsel %vm171_vm7, 1.0, %v398_v18 }
  0x74   :  { %v20_v15 = vpop.permute.xlu1 %19  ;;  %v83_v16 = vpop.permute.xlu0 %82 }
  0x75   :  { %vm21_vm2 = vcmp.eq.s32.totalorder %v20_v15, %v17_v14  ;;  %vm84_vm3 = vcmp.eq.s32.totalorder %v83_v16, %v17_v14 }
  0x76   :  { %v314_v19 = vsel %vm21_vm2, 1.0, %v398_v18  ;;  %v320_v20 = vsel %vm84_vm3, 1.0, %v398_v18 }
  0x77   :  { %316 = vmatmul.msk.f32.vlgmr.msra.gmra.mxu0 %vm24_vm1, %v314_v19  ;;  %322 = vmatmul.msk.f32.vlgmr.msra.gmra.mxu2 %vm24_vm1, %v320_v20 }
  0x7d   :  { %v54_v21 = vpop.permute.xlu1 %53  ;;  %v112_v22 = vpop.permute.xlu0 %111 }
  0x7e   :  { %vm55_vm5 = vcmp.eq.s32.totalorder %v54_v21, %v17_v14  ;;  %vm113_vm6 = vcmp.eq.s32.totalorder %v112_v22, %v17_v14 }
  0x7f   :  { %v317_v24 = vsel %vm55_vm5, 1.0, %v398_v18  ;;  %v323_v25 = vsel %vm113_vm6, 1.0, %v398_v18  ;;  %334 = vmatmul.msk.f32.vlgmr.msrb.gmra.mxu2 %vm24_vm1, %v332_v23 }
  0x80   :  { %319 = vmatmul.msk.f32.vlgmr.msra.gmra.mxu1 %vm24_vm1, %v317_v24  ;;  %325 = vmatmul.msk.f32.vlgmr.msra.gmra.mxu3 %vm24_vm1, %v323_v25 }
  0x86   :  { %v141_v28 = vpop.permute.xlu1 %140 }
  0x87   :  { %vm142_vm9 = vcmp.eq.s32.totalorder %v141_v28, %v17_v14 }
  0x88   :  { %v326_v30 = vsel %vm142_vm9, 1.0, %v398_v18  ;;  %337 = vmatmul.msk.f32.vlgmr.msrb.gmra.mxu3 %vm24_vm1, %v335_v29  ;;  %331 = vmatmul.msk.f32.vlgmr.msrb.gmra.mxu1 %vm24_vm1, %v329_v27 }
  0x89   :  { %328 = vmatmul.msk.f32.vlgmr.msrb.gmra.mxu0 %vm24_vm1, %v326_v30 }
  0xf4   :  { %v49_v33 = vpop.f32.mrf.mxu0 }
  0xfa   :  { %v107_v31 = vpop.f32.mrf.mxu2 }
  0xfb   :  { %260 = vrot.lane.b32.xlu1 %v107_v31, %s399_s1 }
  0xfd   :  { %v78_v32 = vpop.f32.mrf.mxu1 }
  0xfe   :  { %256 = vrot.lane.b32.xlu0 %v78_v32, %s400_s16 }
 0x102   :  { %v223_v37 = vpop.f32.mrf.mxu2 }
 0x103   :  { %v136_v34 = vpop.f32.mrf.mxu3 }
 0x104   :  { %264 = vrot.lane.b32.xlu2 %v136_v34, %s401_s17 }
 0x105   :  { %v194_v35 = vpop.f32.mrf.mxu1 }
 0x106   :  { %v165_v36 = vpop.f32.mrf.mxu0  ;;  %272 = vrot.lane.b32.xlu1 %v194_v35, %s402_s18 }
 0x107   :  { %268 = vrot.lane.b32.xlu0 %v165_v36, %s403_s19 }
 0x10b   :  { %v252_v38 = vpop.f32.mrf.mxu3 }
 0x10c   :  { %276 = vrot.lane.b32.xlu2 %v223_v37, %s404_s20 }
 0x10f   :  { %280 = vrot.lane.b32.xlu0 %v252_v38, %s405_s21 }
 0x15e   :  { %v265_v42 = vpop.permute.xlu2 %264 }
 0x166   :  { %v277_v49 = vpop.permute.xlu2 %276 }
 0x16d   :  { %v261_v40 = vpop.permute.xlu1 %260 }
 0x170   :  { %v257_v39 = vpop.permute.xlu0 %256 }
 0x171   :  { %v284_v41 = vsel %vm283_vm10, %v49_v33, %v257_v39 }
 0x172   :  { %v286_v43 = vsel %vm285_vm11, %v284_v41, %v261_v40 }
 0x173   :  { %v288_v45 = vsel %vm287_vm12, %v286_v43, %v265_v42 }
 0x178   :  { %v273_v47 = vpop.permute.xlu1 %272 }
 0x179   :  { %v269_v44 = vpop.permute.xlu0 %268 }
 0x17a   :  { %v290_v46 = vsel %vm289_vm13, %v288_v45, %v269_v44 }
 0x17b   :  { %v292_v48 = vsel %vm291_vm14, %v290_v46, %v273_v47 }
 0x17c   :  { %v294_v50 = vsel %vm293_vm15, %v292_v48, %v277_v49 }
 0x181   :  { %v281_v51 = vpop.permute.xlu0 %280 }
 0x182   :  { %v296_v52 = vsel %vm295_vm0, %v294_v50, %v281_v51 }
 0x183   :  { %297 = vst [vmem:[#allocation2] sm:$0xff] %v296_v52 }
 0x184   :  { %308 = dma.vmem_to_hbm [thread:$0]  %s304_s23, 128, %s306_s26, [#allocation3]  }
 0x185   :  { %388 = dma.done.wait [#allocation3], 128  }
 0x186   :  { %389 = vsyncadd [#allocation3], 4294967168 }
 0x187   :  { %313 = vsyncpa [#allocation3], 1 }

</bundles_post_ra>
